<compile_context>
chip_gen: v7x
topology: tpu7x:2x2x1
jax: 0.10.0
libtpu: 0.0.40
codegen_flags: <defaults>
</compile_context>

<pallas_src>
import functools

import jax
import jax.numpy as jnp
from jax import lax
from jax.experimental import pallas as pl
from jax.experimental.pallas import tpu as pltpu


def _round_up(x, m):
    return -(-x // m) * m


def _vmem_capacity_bytes():
    """Per-core physical VMEM capacity; conservative fallback if unknown."""
    try:
        info = pltpu.get_tpu_info()
        cap = getattr(info, "vmem_capacity_bytes", None)
        if cap:
            return int(cap)
    except Exception:
        pass
    return 64 * 1024 * 1024  # v7x-sized fallback (safe lower bound)


# ---------------------------------------------------------------------------
# Path 1: table resident in VMEM (small / medium vocab).
# ---------------------------------------------------------------------------
def _embedding_vmem_kernel(ids_ref, table_ref, out_ref, *,
                           tokens_per_block, sublane):
    """Gather T rows from a VMEM-resident table with dense sublane-group stores."""
    # ids_ref:   SMEM (padded_tokens,) int32 scalar-prefetch ref
    # table_ref: VMEM (vocab, embed_dim) -- constant block index, DMA'd once
    # out_ref:   VMEM (tokens_per_block, embed_dim)
    base = pl.program_id(0) * tokens_per_block
    num_groups = tokens_per_block // sublane

    def group_body(g, carry):
        row0 = pl.multiple_of(g * sublane, sublane)
        rows = []
        for t in range(sublane):                    # tiny static unroll
            tok = ids_ref[base + row0 + t]          # dynamic scalar read (SMEM)
            rows.append(table_ref[pl.ds(tok, 1), :])
        # One dense (sublane, embed_dim) store -> unmasked vector stores.
        out_ref[pl.ds(row0, sublane), :] = jnp.concatenate(rows, axis=0)
        return carry

    lax.fori_loop(0, num_groups, group_body, 0, unroll=2)


# ---------------------------------------------------------------------------
# Path 2: table stays in HBM; manual row-gather DMAs, double-buffered across
# grid steps (block i+1's gathers are in flight while block i is stored).
# ---------------------------------------------------------------------------
def _embedding_dma_kernel(ids_ref, table_hbm_ref, out_ref, row_buf, sems, *,
                          tokens_per_block):
    # ids_ref:       SMEM (padded_tokens,) int32 scalar-prefetch ref
    # table_hbm_ref: HBM (vocab, embed_dim), memory_space=pl.ANY
    # out_ref:       VMEM (tokens_per_block, embed_dim)
    # row_buf:       VMEM scratch (2, tokens_per_block, embed_dim)
    # sems:          DMA semaphores (2,) -- one per slot, shared by T row copies
    T = tokens_per_block
    i = pl.program_id(0)
    nblocks = pl.num_programs(0)
    slot = i % 2

    def issue_block(block_idx, s):
        base = block_idx * T

        def body(t, carry):
            tok = ids_ref[base + t]
            pltpu.make_async_copy(table_hbm_ref.at[tok],
                                  row_buf.at[s, t],
                                  sems.at[s]).start()
            return carry

        lax.fori_loop(0, T, body, 0)

    # Prime the pipeline: the first step issues its own block's gathers.
    @pl.when(i == 0)
    def _():
        issue_block(0, 0)

    # Prefetch the next block's rows before waiting on the current block.
    @pl.when(i + 1 < nblocks)
    def _():
        issue_block(i + 1, 1 - slot)

    # Wait for this block's T row copies.  All row copies have identical size,
    # so rebuilding the descriptor with row 0 as src is equivalent to keeping
    # the descriptors returned by .start().
    def wait_body(t, carry):
        pltpu.make_async_copy(table_hbm_ref.at[0],
                              row_buf.at[slot, t],
                              sems.at[slot]).wait()
        return carry

    lax.fori_loop(0, T, wait_body, 0)

    # Single dense, lane-aligned store of the whole block.
    out_ref[...] = row_buf[slot]


def embedding_forward(token_ids, embed_table, *, tokens_per_block=None,
                      force_path=None):
    """token_ids: int (batch, seq); embed_table: (vocab, embed_dim).

    Returns (batch, seq, embed_dim) gathered rows (== nn.Embedding forward).
    force_path: None (auto), "vmem", or "dma" (exercise a specific kernel).
    """
    batch, seq = token_ids.shape
    vocab, embed_dim = embed_table.shape
    dtype = embed_table.dtype
    itemsize = jnp.dtype(dtype).itemsize
    num_tokens = batch * seq

    # Sublane granularity of a dense store: 8 (f32), 16 (bf16), 32 (int8).
    sublane = max(8, 32 // itemsize)

    # Tokens per grid step: large enough to amortize per-step pipeline
    # overhead, but no bigger than the (sublane-rounded) token count.
    if tokens_per_block is None:
        tokens_per_block = 256
    T = min(tokens_per_block, _round_up(num_tokens, sublane))
    T = _round_up(T, sublane)

    padded_tokens = _round_up(num_tokens, T)
    # Clamp ids: nn.Embedding raises on OOB; clamping guarantees in-bounds DMA.
    flat_ids = jnp.clip(token_ids.reshape(num_tokens).astype(jnp.int32),
                        0, vocab - 1)
    if padded_tokens != num_tokens:
        flat_ids = jnp.pad(flat_ids, (0, padded_tokens - num_tokens))
    # TODO(synk): chunk the token axis in the wrapper for very long batch*seq
    # (>= ~64K tokens) so the scalar-prefetched id array stays within SMEM.

    grid = (padded_tokens // T,)
    out_spec = pl.BlockSpec((T, embed_dim), lambda i, ids: (i, 0))
    out_shape = jax.ShapeDtypeStruct((padded_tokens, embed_dim), dtype)

    table_bytes = vocab * embed_dim * itemsize
    out_block_bytes = T * embed_dim * itemsize

    # Generation-aware VMEM budget: physical capacity minus headroom for the
    # compiler's internal scratch.
    capacity = _vmem_capacity_bytes()
    usable = max(32 << 20, capacity - (16 << 20))
    # Table budgeted double-buffered (constant block index).
    # TODO(synk): use pipeline_mode=pl.Buffered(1) on the table block to halve
    # its footprint once single-buffering is verified on all generations.
    resident_need = 2 * table_bytes + 2 * out_block_bytes + (2 << 20)

    if force_path is None:
        use_vmem_table = resident_need <= usable
    else:
        use_vmem_table = (force_path == "vmem")

    cost = pl.CostEstimate(
        flops=0,
        transcendentals=0,
        bytes_accessed=int(2 * padded_tokens * embed_dim * itemsize
                           + table_bytes + padded_tokens * 4),
    )

    if use_vmem_table:
        vmem_limit = int(min(usable, max(32 << 20, resident_need)))
        out_flat = pl.pallas_call(
            functools.partial(_embedding_vmem_kernel,
                              tokens_per_block=T, sublane=sublane),
            out_shape=out_shape,
            grid_spec=pltpu.PrefetchScalarGridSpec(
                num_scalar_prefetch=1,
                grid=grid,
                in_specs=[
                    # Constant block index: table is DMA'd HBM->VMEM once.
                    pl.BlockSpec((vocab, embed_dim), lambda i, ids: (0, 0)),
                ],
                out_specs=out_spec,
            ),
            compiler_params=pltpu.CompilerParams(
                dimension_semantics=("parallel",),
                vmem_limit_bytes=vmem_limit,
            ),
            cost_estimate=cost,
        )(flat_ids, embed_table)
    else:
        out_flat = pl.pallas_call(
            functools.partial(_embedding_dma_kernel, tokens_per_block=T),
            out_shape=out_shape,
            grid_spec=pltpu.PrefetchScalarGridSpec(
                num_scalar_prefetch=1,
                grid=grid,
                in_specs=[pl.BlockSpec(memory_space=pl.ANY)],
                out_specs=out_spec,
                scratch_shapes=[
                    pltpu.VMEM((2, T, embed_dim), dtype),
                    pltpu.SemaphoreType.DMA((2,)),
                ],
            ),
            # Cross-step double buffering carries state between grid steps, so
            # this axis must execute in order ("arbitrary", not "parallel").
            compiler_params=pltpu.CompilerParams(
                dimension_semantics=("arbitrary",),
            ),
            cost_estimate=cost,
        )(flat_ids, embed_table)

    out_flat = out_flat[:num_tokens]
    return out_flat.reshape(batch, seq, embed_dim)


if __name__ == "__main__":
    vocab_size, embed_dim = 64, 128

    key = jax.random.PRNGKey(0)
    key_ids, key_w, key_ids2 = jax.random.split(key, 3)

    # nn.Embedding default init: weight ~ N(0, 1)
    embed_table = jax.random.normal(key_w, (vocab_size, embed_dim),
                                    dtype=jnp.float32)

    # --- small shape consistent with the module forward -------------------
    batch, seq = 2, 8
    token_ids = jax.random.randint(key_ids, (batch, seq), 0, vocab_size,
                                   dtype=jnp.int32)
    ref = jnp.take(embed_table, token_ids, axis=0)

    # Auto path (small table -> VMEM-resident gather).
    out = embedding_forward(token_ids, embed_table)
    out = jax.block_until_ready(out)
    assert out.shape == (batch, seq, embed_dim), out.shape
    assert jnp.allclose(out, ref), "VMEM-resident path mismatch vs reference"

    # Exercise the large-vocab manual-DMA gather path on the same inputs.
    out_dma = embedding_forward(token_ids, embed_table, force_path="dma")
    out_dma = jax.block_until_ready(out_dma)
    assert jnp.allclose(out_dma, ref), "DMA-gather path mismatch vs reference"

    # --- multi-block case: exercises the fori_loop group gather, tail
    # padding, and the cross-step double-buffered DMA prefetch --------------
    batch2, seq2 = 3, 100
    token_ids2 = jax.random.randint(key_ids2, (batch2, seq2), 0, vocab_size,
                                    dtype=jnp.int32)
    ref2 = jnp.take(embed_table, token_ids2, axis=0)

    out2 = embedding_forward(token_ids2, embed_table, tokens_per_block=128)
    out2 = jax.block_until_ready(out2)
    assert jnp.allclose(out2, ref2), "multi-block VMEM path mismatch"

    out2_dma = embedding_forward(token_ids2, embed_table,
                                 tokens_per_block=128, force_path="dma")
    out2_dma = jax.block_until_ready(out2_dma)
    assert jnp.allclose(out2_dma, ref2), "multi-block DMA path mismatch"

    print("KERNEL_OK")
</pallas_src>

<mosaic_0001>
module attributes {stable_mosaic.version = 11 : i64} {
  func.func @_embedding_vmem_kernel(%arg0: i32, %arg1: memref<16xi32, #tpu.memory_space<smem>>, %arg2: memref<64x128xf32, #tpu.memory_space<vmem>>, %arg3: memref<16x128xf32, #tpu.memory_space<vmem>>) attributes {dimension_semantics = [#tpu.dimension_semantics<parallel>], iteration_bounds = array<i64: 1>, scalar_prefetch = 1 : i64, scratch_operands = 0 : i64, tpu.core_type = #tpu.core_type<tc>, window_params = [{pipeline_mode = #tpu.pipeline_mode<synchronous>, transform_indices = @transform_0, window_bounds = array<i64: 64, 128>}, {transform_indices = @transform_1, window_bounds = array<i64: 16, 128>}]} {
    %c16_i32 = arith.constant 16 : i32
    %0 = arith.muli %arg0, %c16_i32 : i32
    %c0_i32 = arith.constant 0 : i32
    %c8_i32 = arith.constant 8 : i32
    %1 = arith.muli %c0_i32, %c8_i32 : i32
    %2 = tpu.assume_multiple %1, 8 : i32
    %3 = arith.addi %0, %2 : i32
    %c0_i32_0 = arith.constant 0 : i32
    %4 = arith.addi %3, %c0_i32_0 : i32
    %5 = arith.index_cast %4 : i32 to index
    %6 = memref.load %arg1[%5] : memref<16xi32, #tpu.memory_space<smem>>
    %7 = arith.index_cast %6 : i32 to index
    %c0 = arith.constant 0 : index
    %8 = vector.load %arg2[%7, %c0] : memref<64x128xf32, #tpu.memory_space<vmem>>, vector<1x128xf32>
    %9 = arith.addi %0, %2 : i32
    %c1_i32 = arith.constant 1 : i32
    %10 = arith.addi %9, %c1_i32 : i32
    %11 = arith.index_cast %10 : i32 to index
    %12 = memref.load %arg1[%11] : memref<16xi32, #tpu.memory_space<smem>>
    %13 = arith.index_cast %12 : i32 to index
    %c0_1 = arith.constant 0 : index
    %14 = vector.load %arg2[%13, %c0_1] : memref<64x128xf32, #tpu.memory_space<vmem>>, vector<1x128xf32>
    %15 = arith.addi %0, %2 : i32
    %c2_i32 = arith.constant 2 : i32
    %16 = arith.addi %15, %c2_i32 : i32
    %17 = arith.index_cast %16 : i32 to index
    %18 = memref.load %arg1[%17] : memref<16xi32, #tpu.memory_space<smem>>
    %19 = arith.index_cast %18 : i32 to index
    %c0_2 = arith.constant 0 : index
    %20 = vector.load %arg2[%19, %c0_2] : memref<64x128xf32, #tpu.memory_space<vmem>>, vector<1x128xf32>
    %21 = arith.addi %0, %2 : i32
    %c3_i32 = arith.constant 3 : i32
    %22 = arith.addi %21, %c3_i32 : i32
    %23 = arith.index_cast %22 : i32 to index
    %24 = memref.load %arg1[%23] : memref<16xi32, #tpu.memory_space<smem>>
    %25 = arith.index_cast %24 : i32 to index
    %c0_3 = arith.constant 0 : index
    %26 = vector.load %arg2[%25, %c0_3] : memref<64x128xf32, #tpu.memory_space<vmem>>, vector<1x128xf32>
    %27 = arith.addi %0, %2 : i32
    %c4_i32 = arith.constant 4 : i32
    %28 = arith.addi %27, %c4_i32 : i32
    %29 = arith.index_cast %28 : i32 to index
    %30 = memref.load %arg1[%29] : memref<16xi32, #tpu.memory_space<smem>>
    %31 = arith.index_cast %30 : i32 to index
    %c0_4 = arith.constant 0 : index
    %32 = vector.load %arg2[%31, %c0_4] : memref<64x128xf32, #tpu.memory_space<vmem>>, vector<1x128xf32>
    %33 = arith.addi %0, %2 : i32
    %c5_i32 = arith.constant 5 : i32
    %34 = arith.addi %33, %c5_i32 : i32
    %35 = arith.index_cast %34 : i32 to index
    %36 = memref.load %arg1[%35] : memref<16xi32, #tpu.memory_space<smem>>
    %37 = arith.index_cast %36 : i32 to index
    %c0_5 = arith.constant 0 : index
    %38 = vector.load %arg2[%37, %c0_5] : memref<64x128xf32, #tpu.memory_space<vmem>>, vector<1x128xf32>
    %39 = arith.addi %0, %2 : i32
    %c6_i32 = arith.constant 6 : i32
    %40 = arith.addi %39, %c6_i32 : i32
    %41 = arith.index_cast %40 : i32 to index
    %42 = memref.load %arg1[%41] : memref<16xi32, #tpu.memory_space<smem>>
    %43 = arith.index_cast %42 : i32 to index
    %c0_6 = arith.constant 0 : index
    %44 = vector.load %arg2[%43, %c0_6] : memref<64x128xf32, #tpu.memory_space<vmem>>, vector<1x128xf32>
    %45 = arith.addi %0, %2 : i32
    %c7_i32 = arith.constant 7 : i32
    %46 = arith.addi %45, %c7_i32 : i32
    %47 = arith.index_cast %46 : i32 to index
    %48 = memref.load %arg1[%47] : memref<16xi32, #tpu.memory_space<smem>>
    %49 = arith.index_cast %48 : i32 to index
    %c0_7 = arith.constant 0 : index
    %50 = vector.load %arg2[%49, %c0_7] : memref<64x128xf32, #tpu.memory_space<vmem>>, vector<1x128xf32>
    %51 = tpu.concatenate %8, %14, %20, %26, %32, %38, %44, %50 in 0 : vector<1x128xf32>, vector<1x128xf32>, vector<1x128xf32>, vector<1x128xf32>, vector<1x128xf32>, vector<1x128xf32>, vector<1x128xf32>, vector<1x128xf32> -> vector<8x128xf32>
    %52 = arith.index_cast %2 : i32 to index
    %c0_8 = arith.constant 0 : index
    %53 = vector.load %arg3[%52, %c0_8] : memref<16x128xf32, #tpu.memory_space<vmem>>, vector<8x128xf32>
    tpu.vector_store %arg3[%52, %c0_8], %51 {strides = array<i32>} : memref<16x128xf32, #tpu.memory_space<vmem>>, vector<8x128xf32>,
    %c1_i32_9 = arith.constant 1 : i32
    %c8_i32_10 = arith.constant 8 : i32
    %54 = arith.muli %c1_i32_9, %c8_i32_10 : i32
    %55 = tpu.assume_multiple %54, 8 : i32
    %56 = arith.addi %0, %55 : i32
    %c0_i32_11 = arith.constant 0 : i32
    %57 = arith.addi %56, %c0_i32_11 : i32
    %58 = arith.index_cast %57 : i32 to index
    %59 = memref.load %arg1[%58] : memref<16xi32, #tpu.memory_space<smem>>
    %60 = arith.index_cast %59 : i32 to index
    %c0_12 = arith.constant 0 : index
    %61 = vector.load %arg2[%60, %c0_12] : memref<64x128xf32, #tpu.memory_space<vmem>>, vector<1x128xf32>
    %62 = arith.addi %0, %55 : i32
    %c1_i32_13 = arith.constant 1 : i32
    %63 = arith.addi %62, %c1_i32_13 : i32
    %64 = arith.index_cast %63 : i32 to index
    %65 = memref.load %arg1[%64] : memref<16xi32, #tpu.memory_space<smem>>
    %66 = arith.index_cast %65 : i32 to index
    %c0_14 = arith.constant 0 : index
    %67 = vector.load %arg2[%66, %c0_14] : memref<64x128xf32, #tpu.memory_space<vmem>>, vector<1x128xf32>
    %68 = arith.addi %0, %55 : i32
    %c2_i32_15 = arith.constant 2 : i32
    %69 = arith.addi %68, %c2_i32_15 : i32
    %70 = arith.index_cast %69 : i32 to index
    %71 = memref.load %arg1[%70] : memref<16xi32, #tpu.memory_space<smem>>
    %72 = arith.index_cast %71 : i32 to index
    %c0_16 = arith.constant 0 : index
    %73 = vector.load %arg2[%72, %c0_16] : memref<64x128xf32, #tpu.memory_space<vmem>>, vector<1x128xf32>
    %74 = arith.addi %0, %55 : i32
    %c3_i32_17 = arith.constant 3 : i32
    %75 = arith.addi %74, %c3_i32_17 : i32
    %76 = arith.index_cast %75 : i32 to index
    %77 = memref.load %arg1[%76] : memref<16xi32, #tpu.memory_space<smem>>
    %78 = arith.index_cast %77 : i32 to index
    %c0_18 = arith.constant 0 : index
    %79 = vector.load %arg2[%78, %c0_18] : memref<64x128xf32, #tpu.memory_space<vmem>>, vector<1x128xf32>
    %80 = arith.addi %0, %55 : i32
    %c4_i32_19 = arith.constant 4 : i32
    %81 = arith.addi %80, %c4_i32_19 : i32
    %82 = arith.index_cast %81 : i32 to index
    %83 = memref.load %arg1[%82] : memref<16xi32, #tpu.memory_space<smem>>
    %84 = arith.index_cast %83 : i32 to index
    %c0_20 = arith.constant 0 : index
    %85 = vector.load %arg2[%84, %c0_20] : memref<64x128xf32, #tpu.memory_space<vmem>>, vector<1x128xf32>
    %86 = arith.addi %0, %55 : i32
    %c5_i32_21 = arith.constant 5 : i32
    %87 = arith.addi %86, %c5_i32_21 : i32
    %88 = arith.index_cast %87 : i32 to index
    %89 = memref.load %arg1[%88] : memref<16xi32, #tpu.memory_space<smem>>
    %90 = arith.index_cast %89 : i32 to index
    %c0_22 = arith.constant 0 : index
    %91 = vector.load %arg2[%90, %c0_22] : memref<64x128xf32, #tpu.memory_space<vmem>>, vector<1x128xf32>
    %92 = arith.addi %0, %55 : i32
    %c6_i32_23 = arith.constant 6 : i32
    %93 = arith.addi %92, %c6_i32_23 : i32
    %94 = arith.index_cast %93 : i32 to index
    %95 = memref.load %arg1[%94] : memref<16xi32, #tpu.memory_space<smem>>
    %96 = arith.index_cast %95 : i32 to index
    %c0_24 = arith.constant 0 : index
    %97 = vector.load %arg2[%96, %c0_24] : memref<64x128xf32, #tpu.memory_space<vmem>>, vector<1x128xf32>
    %98 = arith.addi %0, %55 : i32
    %c7_i32_25 = arith.constant 7 : i32
    %99 = arith.addi %98, %c7_i32_25 : i32
    %100 = arith.index_cast %99 : i32 to index
    %101 = memref.load %arg1[%100] : memref<16xi32, #tpu.memory_space<smem>>
    %102 = arith.index_cast %101 : i32 to index
    %c0_26 = arith.constant 0 : index
    %103 = vector.load %arg2[%102, %c0_26] : memref<64x128xf32, #tpu.memory_space<vmem>>, vector<1x128xf32>
    %104 = tpu.concatenate %61, %67, %73, %79, %85, %91, %97, %103 in 0 : vector<1x128xf32>, vector<1x128xf32>, vector<1x128xf32>, vector<1x128xf32>, vector<1x128xf32>, vector<1x128xf32>, vector<1x128xf32>, vector<1x128xf32> -> vector<8x128xf32>
    %105 = arith.index_cast %55 : i32 to index
    %c0_27 = arith.constant 0 : index
    %106 = vector.load %arg3[%105, %c0_27] : memref<16x128xf32, #tpu.memory_space<vmem>>, vector<8x128xf32>
    tpu.vector_store %arg3[%105, %c0_27], %104 {strides = array<i32>} : memref<16x128xf32, #tpu.memory_space<vmem>>, vector<8x128xf32>,
    %c2_i32_28 = arith.constant 2 : i32
    return
  }
  func.func @transform_0(%arg0: i32, %arg1: memref<16xi32, #tpu.memory_space<smem>>) -> (i32, i32) {
    %c0_i32 = arith.constant 0 : i32
    %c0_i32_0 = arith.constant 0 : i32
    %c0_i32_1 = arith.constant 0 : i32
    return %c0_i32, %c0_i32_0 : i32, i32
  }
  func.func @transform_1(%arg0: i32, %arg1: memref<16xi32, #tpu.memory_space<smem>>) -> (i32, i32) {
    %c0_i32 = arith.constant 0 : i32
    %c0_i32_0 = arith.constant 0 : i32
    return %arg0, %c0_i32 : i32, i32
  }
}

</mosaic_0001>

<bundles_post_ra>
// kernel: tpu_custom_call.1
= control target key start
LH: loop header
LB: loop body
LE: loop exit
PB: predicated region body
PF: predicated region fallthrough
CT: control target
= control target key end

     0   :  { %s360_s0 = inlined_call_operand.hbm [shape: s32[16], index: 0, kind: input, shape index: {}]   ;;  %s361_s1 = inlined_call_operand.hbm [shape: f32[64,128], index: 1, kind: input, shape index: {}]   ;;  %s362_s2 = inlined_call_operand.hbm [shape: f32[16,128], index: 2, kind: output, shape index: {}]  }
   0x1   :  { %s212_s11 = scalar_lea.hbm %s360_s0, 16 }
   0x2   :  { %p213_p0 = scmp.ne.s32.totalorder %s360_s0, %s212_s11  ;;  %p216_p1 = scmp.lt.u32.totalorder %s212_s11, %s360_s0 }
   0x4   :  { %p218_p2 = pnand %p216_p1, %p213_p0 }
   0x6   :  { %221 = shalt.err (!%p218_p2)  }
   0x7   :  { %s272_s16 = smov [#allocation3]  }
   0x8   :  { %8 = dma.hbm_to_smem %s360_s0, 16, %s272_s16, [#allocation2] }
   0x9   :  { %266 = dma.done.wait [#allocation2], 16 }
   0xa   :  { %267 = vsyncadd [#allocation2], 4294967280 }
   0xb   :  { %10 = sfence }
   0xc   :  { %11 = vsyncpa [#allocation5], 0 }
   0xd   :  { %12 = vsyncpa [#allocation6], 0  ;;  %s273_s19 = smov [#allocation4]   ;;  %s222_s23 = scalar_lea.hbm %s361_s1, 1024 }
   0xe   :  { %s18_s20 = sshll.u32 %s273_s19, 4  ;;  %p223_p3 = scmp.ne.s32.totalorder %s361_s1, %s222_s23  ;;  %s19_s20 = int_to_ptr.vmem [resolvable:$true] %s18_s20 }
   0xf   :  { %p226_p4 = scmp.lt.u32.totalorder %s222_s23, %s361_s1 }
  0x11   :  { %p228_p5 = pnand %p226_p4, %p223_p3 }
  0x13   :  { %231 = shalt.err (!%p228_p5)
}
  0x14   :  { %s232_s0 = scalar_lea.vmem %s19_s20, 1024  ;;  %p237_p7 = scmp.lt.s32.totalorder %s19_s20, %s19_s20 }
  0x15   :  { %p233_p6 = scmp.ne.s32.totalorder %s19_s20, %s232_s0  ;;  %p238_p8 = scmp.lt.s32.totalorder %s232_s0, %s232_s0 }
  0x17   :  { %p239_p9 = por %p238_p8, %p237_p7 }
  0x19   :  { %p240_p10 = pnand %p239_p9, %p233_p6 }
  0x1b   :  { %243 = shalt.err (!%p240_p10)
}
  0x1c   :  { %s274_s28 = smov 128   ;;  %s275_s29 = smov 8  }
  0x1d   :  { %24 = dma.hbm_to_vmem [thread:$0]  %s361_s1, 1024, %s19_s20, [#allocation5], %s274_s28, %s274_s28, %s275_s29  }
  0x1e   :  { %268 = dma.done.wait [#allocation5], 1024  }
  0x1f   :  { %269 = vsyncadd [#allocation5], 4294966272  ;;  %s30_s4 = sld [smem:[#allocation3]]  ;;  %s192_s5 = sld [smem:[#allocation3 + $0x1]]  ;;  %vm82_vm0 = vcmask 1040384   ;;  %vm84_vm1 = vcmask 1041408  }
  0x20   :  { %s193_s6 = sld [smem:[#allocation3 + $0x2]]  ;;  %s194_s7 = sld [smem:[#allocation3 + $0x3]]  ;;  %vm86_vm2 = vcmask 1042432   ;;  %vm88_vm3 = vcmask 1043456   ;;  %vm90_vm4 = vcmask 1044480   ;;  %vm92_vm5 = vcmask 1045504  }
  0x21   :  { %s195_s8 = sld [smem:[#allocation3 + $0x4]]  ;;  %s196_s9 = sld [smem:[#allocation3 + $0x5]]  ;;  %vm94_vm6 = vcmask 1046528  }
  0x22   :  { %s197_s10 = sld [smem:[#allocation3 + $0x6]]  ;;  %s198_s11 = sld [smem:[#allocation3 + $0x7]] }
  0x23   :  { %s319_s12 = sld [smem:[#allocation3 + $0x8]]  ;;  %s321_s13 = sld [smem:[#allocation3 + $0x9]] }
  0x24   :  { %s323_s14 = sld [smem:[#allocation3 + $0xa]]  ;;  %s325_s15 = sld [smem:[#allocation3 + $0xb]] }
  0x25   :  { %s31_s1 = scalar_lea.vmem [#allocation4], %s30_s4  ;;  %s35_s16 = scalar_lea.vmem [#allocation4], %s192_s5 }
  0x26   :  { %v32_v0 = vld [vmem:[%s31_s1] sm:$0x1]  ;;  %s39_s17 = scalar_lea.vmem [#allocation4], %s193_s6  ;;  %s43_s18 = scalar_lea.vmem [#allocation4], %s194_s7 }
  0x27   :  { %v36_v1 = vld [vmem:[%s35_s16] sm:$0x1]  ;;  %s47_s19 = scalar_lea.vmem [#allocation4], %s195_s8  ;;  %s51_s20 = scalar_lea.vmem [#allocation4], %s196_s9 }
  0x28   :  { %v40_v2 = vld [vmem:[%s39_s17] sm:$0x1]  ;;  %s55_s21 = scalar_lea.vmem [#allocation4], %s197_s10  ;;  %s59_s22 = scalar_lea.vmem [#allocation4], %s198_s11  ;;  %v62_v8 = vrot.slane %v36_v1, 7 }
  0x29   :  { %v44_v3 = vld [vmem:[%s43_s18] sm:$0x1]  ;;  %v65_v9 = vrot.slane %v40_v2, 6  ;;  %s99_s23 = scalar_lea.vmem [#allocation4], %s319_s12  ;;  %s103_s24 = scalar_lea.vmem [#allocation4], %s321_s13 }
  0x2a   :  { %v48_v4 = vld [vmem:[%s47_s19] sm:$0x1]  ;;  %v68_v10 = vrot.slane %v44_v3, 5  ;;  %v83_v15 = vsel %vm82_vm0, %v32_v0, %v62_v8  ;;  %s107_s25 = scalar_lea.vmem [#allocation4], %s323_s14  ;;  %s203_s26 = sld [smem:[#allocation3 + $0xc]] }
  0x2b   :  { %v52_v5 = vld [vmem:[%s51_s20] sm:$0x1]  ;;  %v71_v11 = vrot.slane %v48_v4, 4  ;;  %v85_v18 = vsel %vm84_vm1, %v83_v15, %v65_v9  ;;  %s111_s27 = scalar_lea.vmem [#allocation4], %s325_s15  ;;  %s204_s0 = sld [smem:[#allocation3 + $0xd]] }
  0x2c   :  { %v56_v6 = vld [vmem:[%s55_s21] sm:$0x1]  ;;  %v74_v12 = vrot.slane %v52_v5, 3  ;;  %v87_v21 = vsel %vm86_vm2, %v85_v18, %v68_v10  ;;  %s205_s30 = sld [smem:[#allocation3 + $0xe]]  ;;  %s206_s3 = sld [smem:[#allocation3 + $0xf]] }
  0x2d   :  { %v60_v7 = vld [vmem:[%s59_s22] sm:$0x1]  ;;  %v77_v13 = vrot.slane %v56_v6, 2  ;;  %v89_v23 = vsel %vm88_vm3, %v87_v21, %v71_v11  ;;  %s276_s8 = smov [#allocation7]  }
  0x2e   :  { %v80_v14 = vrot.slane %v60_v7, 1  ;;  %v100_v16 = vld [vmem:[%s99_s23] sm:$0x1]  ;;  %v91_v26 = vsel %vm90_vm4, %v89_v23, %v74_v12  ;;  %s164_s9 = sshll.u32 %s276_s8, 4  ;;  %s165_s9 = int_to_ptr.vmem [resolvable:$true] %s164_s9 }
  0x2f   :  { %v104_v17 = vld [vmem:[%s103_s24] sm:$0x1]  ;;  %v93_v28 = vsel %vm92_vm5, %v91_v26, %v77_v13  ;;  %s244_s10 = scalar_lea.vmem %s165_s9, 256  ;;  %p249_p12 = scmp.lt.s32.totalorder %s165_s9, %s165_s9 }
  0x30   :  { %v108_v19 = vld [vmem:[%s107_s25] sm:$0x1]  ;;  %v130_v20 = vrot.slane %v104_v17, 7  ;;  %v95_v30 = vsel %vm94_vm6, %v93_v28, %v80_v14  ;;  %s115_s4 = scalar_lea.vmem [#allocation4], %s203_s26  ;;  %p245_p11 = scmp.ne.s32.totalorder %s165_s9, %s244_s10 }
  0x31   :  { %v112_v22 = vld [vmem:[%s111_s27] sm:$0x1]  ;;  %v133_v24 = vrot.slane %v108_v19, 6  ;;  %96 = vst [vmem:[#allocation7] sm:$0xff] %v95_v30  ;;  %s119_s5 = scalar_lea.vmem [#allocation4], %s204_s0  ;;  %p250_p13 = scmp.lt.s32.totalorder %s244_s10, %s244_s10 }
  0x32   :  { %v150_v25 = vsel %vm82_vm0, %v100_v16, %v130_v20  ;;  %v136_v27 = vrot.slane %v112_v22, 5  ;;  %v116_v31 = vld [vmem:[%s115_s4] sm:$0x1]  ;;  %s123_s6 = scalar_lea.vmem [#allocation4], %s205_s30  ;;  %s127_s7 = scalar_lea.vmem [#allocation4], %s206_s3 }
  0x33   :  { %v151_v29 = vsel %vm84_vm1, %v150_v25, %v133_v24  ;;  %v120_v33 = vld [vmem:[%s119_s5] sm:$0x1]  ;;  %v139_v35 = vrot.slane %v116_v31, 4  ;;  %p251_p0 = por %p250_p13, %p249_p12 }
  0x34   :  { %v152_v32 = vsel %vm86_vm2, %v151_v29, %v136_v27  ;;  %v124_v34 = vld [vmem:[%s123_s6] sm:$0x1]  ;;  %v142_v37 = vrot.slane %v120_v33, 3 }
  0x35   :  { %v128_v36 = vld [vmem:[%s127_s7] sm:$0x1]  ;;  %v145_v38 = vrot.slane %v124_v34, 2  ;;  %v153_v40 = vsel %vm88_vm3, %v152_v32, %v139_v35  ;;  %p252_p1 = pnand %p251_p0, %p245_p11 }
  0x36   :  { %v148_v39 = vrot.slane %v128_v36, 1  ;;  %v154_v41 = vsel %vm90_vm4, %v153_v40, %v142_v37 }
  0x37   :  { %v155_v42 = vsel %vm92_vm5, %v154_v41, %v145_v38 }
  0x38   :  { %v156_v43 = vsel %vm94_vm6, %v155_v42, %v148_v39 }
  0x39   :  { %158 = vst [vmem:[#allocation7 + $0x8] sm:$0xff] %v156_v43 }
  0x3a   :  { %255 = shalt.err (!%p252_p1)
}
  0x3b   :  { %s256_s13 = scalar_lea.hbm %s362_s2, 256 }
  0x3c   :  { %p257_p2 = scmp.ne.s32.totalorder %s362_s2, %s256_s13  ;;  %p260_p3 = scmp.lt.u32.totalorder %s256_s13, %s362_s2 }
  0x3e   :  { %p262_p4 = pnand %p260_p3, %p257_p2 }
  0x40   :  { %265 = shalt.err (!%p262_p4)
}
  0x41   :  { %170 = dma.vmem_to_hbm [thread:$0]  %s165_s9, 256, %s362_s2, [#allocation6], %s274_s28, %s274_s28, %s275_s29  }
  0x42   :  { %270 = dma.done.wait [#allocation6], 256  }
  0x43   :  { %271 = vsyncadd [#allocation6], 4294967040 }
  0x44   :  { %174 = vsyncpa [#allocation5], 1 }
  0x45   :  { %175 = vsyncpa [#allocation6], 1 }

</bundles_post_ra>
